<compile_context>
chip_gen: v5e
topology: v5e:2x2
jax: 0.10.0
libtpu: 0.0.40
codegen_flags: <defaults>
</compile_context>

<pallas_src>
import jax
import jax.numpy as jnp
from jax.experimental import pallas as pl
from jax.experimental.pallas import tpu as pltpu

EPS = 1e-10
_ROW_CAP = 4096           # hard cap on the row tile
_ROW_FLOOR = 512          # 512-row tiles already reach ~85% of HBM roofline
_MIN_TILES = 8            # >=4 tiles per TC on 2-TC chips -> pipeline overlap


def _round_up(v, m):
    return ((v + m - 1) // m) * m


def _vmem_budgets():
    """(vmem_limit_bytes, tile_budget_bytes) derived from the chip generation."""
    try:
        cap = int(pltpu.get_tpu_info().vmem_capacity_bytes)
    except Exception:
        cap = 64 * 1024 * 1024          # v7x per-TC VMEM: safe lower bound
    # Stay well under physical VMEM (48 MiB on v7x's 64 MiB, 96 MiB on 128 MiB
    # chips); let the pipelined tiles use about half of that.
    limit = min((cap * 3) // 4, 96 * 1024 * 1024)
    return limit, limit // 2


def _pick_block_rows(n, c, itemsize, tile_budget):
    """Dtype- and VMEM-aware row tile giving >=8 balanced tiles when N allows."""
    pack = max(8, 32 // itemsize)               # sublane pack: 8 f32, 16 bf16, 32 int8
    # Per tile row: in + out, double-buffered, at input width, plus ~3 f32-wide
    # temporaries (f32 upcast, squared intermediate, pre-cast product).
    bytes_per_row = c * (4 * itemsize + 3 * 4)
    tb_vmem = max(pack, (tile_budget // max(bytes_per_row, 1)) // pack * pack)

    n_pad = _round_up(n, pack)
    # Target >=_MIN_TILES tiles so the DMA pipeline prologue/epilogue overlap
    # and both v7x TCs get work, but never shrink below ~512 rows (or the
    # whole array when it is small).
    tb_for_tiles = _round_up(pl.cdiv(n_pad, _MIN_TILES), pack)
    row_floor = min(_ROW_FLOOR, n_pad)
    tb = min(tb_vmem, _ROW_CAP, max(tb_for_tiles, row_floor))
    tb = max(pack, (tb // pack) * pack)

    if n_pad > tb:
        # Balance: even tile count and near-equal tiles (no tiny ragged tail),
        # so a 2-TC chip never has one core streaming a whole extra tile.
        tiles = _round_up(pl.cdiv(n_pad, tb), 2)
        tb = max(pack, _round_up(pl.cdiv(n_pad, tiles), pack))
    return tb


def _l2norm_kernel(x_ref, w_ref, o_ref):
    # x_ref: (TB, C) tile of activations, w_ref: (1, C) scale weights.
    xf = x_ref[...].astype(jnp.float32)
    norm = jnp.sqrt(jnp.sum(xf * xf, axis=1, keepdims=True)) + EPS    # (TB, 1)
    w = w_ref[...].astype(jnp.float32)                                # (1, C)
    # True divide (not reciprocal*mul) to match the PyTorch reference numerics;
    # the kernel is HBM-bound so the per-element divide is hidden.
    o_ref[...] = (xf / norm * w).astype(o_ref.dtype)


def l2norm(x, weight, *, block_rows=None, donate_x=False):
    """x: (N, C), weight: (C,). Returns (N, C) with same dtype as x."""
    n, c = x.shape
    itemsize = jnp.dtype(x.dtype).itemsize
    vmem_limit, tile_budget = _vmem_budgets()

    pack = max(8, 32 // itemsize)
    if block_rows is not None:
        tb = max(pack, _round_up(block_rows, pack))
    else:
        tb = _pick_block_rows(n, c, itemsize, tile_budget)
    grid = (pl.cdiv(n, tb),)

    # Last block dim is always the full C: lane-dense stores when C % 128 == 0,
    # compiler-masked ragged lanes otherwise — never an extra HBM pad/slice pass.
    out = pl.pallas_call(
        _l2norm_kernel,
        out_shape=jax.ShapeDtypeStruct((n, c), x.dtype),
        grid_spec=pltpu.PrefetchScalarGridSpec(
            num_scalar_prefetch=0,
            grid=grid,
            in_specs=[
                pl.BlockSpec((tb, c), lambda i: (i, 0)),
                pl.BlockSpec((1, c), lambda i: (0, 0)),
            ],
            out_specs=pl.BlockSpec((tb, c), lambda i: (i, 0)),
        ),
        compiler_params=pltpu.CompilerParams(
            dimension_semantics=("parallel",),
            vmem_limit_bytes=vmem_limit,
        ),
        cost_estimate=pl.CostEstimate(
            flops=4 * n * c,
            transcendentals=n * (c + 1),              # per-row sqrt + per-elem divide
            bytes_accessed=2 * n * c * itemsize + c * 4,
        ),
        # Opt-in donation: output aliases x (same shape/dtype) -> halves peak
        # HBM footprint. Only safe if the caller no longer needs x.
        input_output_aliases=({0: 0} if donate_x else {}),
    )(x, weight.astype(jnp.float32).reshape(1, c))

    return out


class L2Norm:
    """JAX/Pallas port of the PyTorch L2Norm module."""

    def __init__(self, n_channels, scale=1.0):
        self.n_channels = n_channels
        self.scale = scale
        self.eps = EPS
        # Deterministic init matching the module: weight = scale everywhere.
        self.weight = jnp.full((n_channels,), scale, dtype=jnp.float32)

    def __call__(self, x):
        return l2norm(x, self.weight)


def _reference(x, weight):
    xf = x.astype(jnp.float32)
    norm = jnp.sqrt(jnp.sum(xf * xf, axis=1, keepdims=True)) + EPS
    return (xf / norm * weight.reshape(1, -1).astype(jnp.float32)).astype(x.dtype)


if __name__ == "__main__":
    key = jax.random.PRNGKey(0)

    # 1) Small shape consistent with the module: per-sample feature vectors (N, C).
    batch, n_channels = 8, 32
    x = jax.random.normal(key, (batch, n_channels), dtype=jnp.float32)
    mod = L2Norm(n_channels, scale=2.0)
    out = jax.block_until_ready(mod(x))
    ref = _reference(x, mod.weight)
    assert out.shape == (batch, n_channels)
    assert out.dtype == x.dtype
    assert jnp.allclose(out, ref, atol=1e-6, rtol=1e-5), "mismatch (small, C=32)"

    # 2) Lane-aligned channels (VGG-like C=512), batch not a multiple of the row
    #    tile / sublane pack (exercises masked last-tile writeback).
    x2 = jax.random.normal(jax.random.PRNGKey(1), (300, 512), dtype=jnp.float32)
    mod2 = L2Norm(512, scale=1.5)
    out2 = jax.block_until_ready(mod2(x2))
    ref2 = _reference(x2, mod2.weight)
    assert out2.shape == (300, 512)
    assert jnp.allclose(out2, ref2, atol=1e-5, rtol=1e-5), "mismatch (C=512)"

    # 3) C not a multiple of 128: ragged lanes handled inside the kernel
    #    (no wrapper-side pad/slice HBM passes).
    x3 = jax.random.normal(jax.random.PRNGKey(2), (64, 200), dtype=jnp.float32)
    mod3 = L2Norm(200, scale=0.5)
    out3 = jax.block_until_ready(mod3(x3))
    ref3 = _reference(x3, mod3.weight)
    assert out3.shape == (64, 200)
    assert jnp.allclose(out3, ref3, atol=1e-5, rtol=1e-5), "mismatch (C=200)"

    # 4) bf16 activations (dtype-aware sublane pack; f32 accumulation inside).
    x4 = jax.random.normal(jax.random.PRNGKey(3), (48, 96)).astype(jnp.bfloat16)
    mod4 = L2Norm(96, scale=1.0)
    out4 = jax.block_until_ready(mod4(x4))
    ref4 = _reference(x4, mod4.weight)
    assert out4.shape == (48, 96)
    assert out4.dtype == jnp.bfloat16
    assert jnp.allclose(out4.astype(jnp.float32), ref4.astype(jnp.float32),
                        atol=2e-2, rtol=2e-2), "mismatch (bf16)"

    print("KERNEL_OK")
</pallas_src>

<mosaic_0001>
module attributes {stable_mosaic.version = 11 : i64} {
  func.func @_l2norm_kernel(%arg0: i32, %arg1: memref<8x32xf32, #tpu.memory_space<vmem>>, %arg2: memref<1x32xf32, #tpu.memory_space<vmem>>, %arg3: memref<8x32xf32, #tpu.memory_space<vmem>>) attributes {dimension_semantics = [#tpu.dimension_semantics<parallel>], iteration_bounds = array<i64: 1>, scalar_prefetch = 0 : i64, scratch_operands = 0 : i64, tpu.core_type = #tpu.core_type<tc>, window_params = [{transform_indices = @transform_0, window_bounds = array<i64: 8, 32>}, {pipeline_mode = #tpu.pipeline_mode<synchronous>, transform_indices = @transform_1, window_bounds = array<i64: 1, 32>}, {transform_indices = @transform_2, window_bounds = array<i64: 8, 32>}]} {
    %c0 = arith.constant 0 : index
    %c0_0 = arith.constant 0 : index
    %0 = vector.load %arg1[%c0, %c0_0] : memref<8x32xf32, #tpu.memory_space<vmem>>, vector<8x32xf32>
    %1 = arith.mulf %0, %0 : vector<8x32xf32>
    %cst = arith.constant dense<0.000000e+00> : vector<8xf32>
    %2 = vector.multi_reduction <add>, %1, %cst [1] : vector<8x32xf32> to vector<8xf32>
    %3 = vector.shape_cast %2 : vector<8xf32> to vector<8x1xf32>
    %4 = math.sqrt %3 : vector<8x1xf32>
    %cst_1 = arith.constant 1.000000e-10 : f32
    %5 = vector.broadcast %cst_1 : f32 to vector<8x1xf32>
    %6 = arith.addf %4, %5 : vector<8x1xf32>
    %c0_2 = arith.constant 0 : index
    %c0_3 = arith.constant 0 : index
    %7 = vector.load %arg2[%c0_2, %c0_3] : memref<1x32xf32, #tpu.memory_space<vmem>>, vector<1x32xf32>
    %8 = vector.broadcast %6 : vector<8x1xf32> to vector<8x32xf32>
    %9 = arith.divf %0, %8 : vector<8x32xf32>
    %10 = vector.broadcast %7 : vector<1x32xf32> to vector<8x32xf32>
    %11 = arith.mulf %9, %10 : vector<8x32xf32>
    %c0_4 = arith.constant 0 : index
    %c0_5 = arith.constant 0 : index
    %12 = vector.load %arg3[%c0_4, %c0_5] : memref<8x32xf32, #tpu.memory_space<vmem>>, vector<8x32xf32>
    tpu.vector_store %arg3[%c0_4, %c0_5], %11 {strides = array<i32>} : memref<8x32xf32, #tpu.memory_space<vmem>>, vector<8x32xf32>,
    return
  }
  func.func @transform_0(%arg0: i32) -> (i32, i32) {
    %c0_i32 = arith.constant 0 : i32
    %c0_i32_0 = arith.constant 0 : i32
    return %arg0, %c0_i32 : i32, i32
  }
  func.func @transform_1(%arg0: i32) -> (i32, i32) {
    %c0_i32 = arith.constant 0 : i32
    %c0_i32_0 = arith.constant 0 : i32
    %c0_i32_1 = arith.constant 0 : i32
    return %c0_i32, %c0_i32_0 : i32, i32
  }
  func.func @transform_2(%arg0: i32) -> (i32, i32) {
    %c0_i32 = arith.constant 0 : i32
    %c0_i32_0 = arith.constant 0 : i32
    return %arg0, %c0_i32 : i32, i32
  }
}

</mosaic_0001>

<bundles_post_ra>
// kernel: tpu_custom_call.1
= control target key start
LH: loop header
LB: loop body
LE: loop exit
PB: predicated region body
PF: predicated region fallthrough
CT: control target
= control target key end

     0   :  { %7 = vsyncpa [#allocation3], 0  ;;  %s213_s0 = inlined_call_operand.hbm [shape: f32[8,32], index: 0, kind: input, shape index: {}]   ;;  %s214_s1 = inlined_call_operand.hbm [shape: f32[1,32], index: 1, kind: input, shape index: {}]   ;;  %s215_s2 = inlined_call_operand.hbm [shape: f32[8,32], index: 2, kind: output, shape index: {}]  }
   0x1   :  { %8 = vsyncpa [#allocation6], 0 }
   0x2   :  { %9 = vsyncpa [#allocation4], 0  ;;  %s15_s11 = sshll.u32 %s213_s0, 4  ;;  %s184_s12 = smov [#allocation2]   ;;  %s16_s11 = int_to_ptr.hbm [resolvable:$true] %s15_s11 }
   0x3   :  { %s17_s13 = sshll.u32 %s184_s12, 4  ;;  %s26_s16 = sshll.u32 %s214_s1, 4  ;;  %s18_s13 = int_to_ptr.vmem [resolvable:$true] %s17_s13  ;;  %s27_s16 = int_to_ptr.hbm [resolvable:$true] %s26_s16 }
   0x4   :  { %20 = dma.hbm_to_vmem [thread:$0]  %s16_s11, 128, %s18_s13, [#allocation3]  }
   0x5   :  { %s185_s17 = smov [#allocation5]  }
   0x6   :  { %s28_s18 = sshll.u32 %s185_s17, 4  ;;  %s29_s18 = int_to_ptr.vmem [resolvable:$true] %s28_s18 }
   0x7   :  { %31 = dma.hbm_to_vmem [thread:$0]  %s27_s16, 16, %s29_s18, [#allocation6]  }
   0x8   :  { %178 = dma.done.wait [#allocation3], 128  }
   0x9   :  { %179 = vsyncadd [#allocation3], 4294967168 }
   0xa   :  { %180 = dma.done.wait [#allocation6], 16  }
   0xb   :  { %181 = vsyncadd [#allocation6], 4294967280  ;;  %v40_v0 = vld [vmem:[#allocation2] sm:$0xff]  ;;  %vm42_vm0 = vcmask 261120   ;;  %v101_v24 = vld [vmem:[#allocation5] ss:$0 sm:$0xff] }
   0xc   :  { %v41_v1 = vmul.f32 %v40_v0, %v40_v0  ;;  %s186_s0 = smov [#allocation7]   ;;  %s87_s21 = sshll.u32 %s215_s2, 4  ;;  %s88_s21 = int_to_ptr.hbm [resolvable:$true] %s87_s21 }
   0xd   :  { %s85_s1 = sshll.u32 %s186_s0, 4  ;;  %s86_s1 = int_to_ptr.vmem [resolvable:$true] %s85_s1 }
   0xe   :  { %v43_v2 = vsel %vm42_vm0, %v41_v1, 0.0 }
   0xf   :  { %44 = vadd.xlane.f32.xlu0 %v43_v2 }
  0x82   :  { %v45_v3 = vpop.xlane.xlu0 %44 }
  0x83   :  { %102 = vrsqrt.f32 %v45_v3  ;;  %vm53_vm1 = vcmp.eq.f32.partialorder %v45_v3, inf  ;;  %v56_v11 = vand.u32 2147483648, %v45_v3  ;;  %vm55_vm2 = vcmp.eq.f32.partialorder %v45_v3, 0.0 }
  0x89   :  { %v103_v4 = vpop.eup %102 }
  0x8a   :  { %v47_v5 = vmul.f32 %v103_v4, %v45_v3 }
  0x8c   :  { %v48_v6 = vmul.f32 %v103_v4, %v47_v5 }
  0x8e   :  { %v49_v7 = vmul.f32 0.5, %v48_v6 }
  0x90   :  { %v50_v8 = vsub.f32 1.5, %v49_v7 }
  0x92   :  { %v51_v9 = vmul.f32 %v103_v4, %v50_v8 }
  0x94   :  { %v52_v10 = vmul.f32 %v51_v9, %v45_v3 }
  0x96   :  { %v54_v12 = vsel %vm53_vm1, %v45_v3, %v52_v10 }
  0x97   :  { %v57_v13 = vsel %vm55_vm2, %v56_v11, %v54_v12 }
  0x98   :  { %v58_v14 = vadd.f32 1e-10, %v57_v13 }
  0x9a   :  { %104 = vrcp.f32 %v58_v14  ;;  %v71_v18 = vand.u32 2147483648, %v58_v14  ;;  %v69_v20 = vand.u32 2147483647, %v58_v14  ;;  %vm65_vm4 = vweird.f32 %v58_v14 }
  0x9c   :  { %v72_v22 = vor.u32 1.1754944e-38, %v71_v18  ;;  %vm70_vm6 = vcmp.eq.f32.partialorder %v69_v20, 8.507059e+37 }
  0xa0   :  { %v105_v15 = vpop.eup %104 }
  0xa1   :  { %v61_v16 = vmul.f32 %v105_v15, %v58_v14  ;;  %vm66_vm3 = vweird.f32 %v105_v15 }
  0xa2   :  { %vm67_vm5 = vmor %vm65_vm4, %vm66_vm3 }
  0xa3   :  { %v62_v17 = vsub.f32 1.0, %v61_v16 }
  0xa5   :  { %v63_v19 = vmul.f32 %v105_v15, %v62_v17 }
  0xa7   :  { %v64_v21 = vadd.f32 %v105_v15, %v63_v19 }
  0xa9   :  { %v68_v23 = vsel %vm67_vm5, %v105_v15, %v64_v21 }
  0xaa   :  { %v73_v25 = vsel %vm70_vm6, %v72_v22, %v68_v23 }
  0xab   :  { %v74_v26 = vmul.f32 %v73_v25, %v40_v0 }
  0xad   :  { %v78_v27 = vmul.f32 %v101_v24, %v74_v26 }
  0xaf   :  { %79 = vst.msk [vmem:[#allocation7] sm:$0xff] %vm42_vm0, %v78_v27 }
  0xb0   :  { %90 = dma.vmem_to_hbm [thread:$0]  %s86_s1, 128, %s88_s21, [#allocation4]  }
  0xb1   :  { %182 = dma.done.wait [#allocation4], 128  }
  0xb2   :  { %183 = vsyncadd [#allocation4], 4294967168 }
  0xb3   :  { %95 = vsyncpa [#allocation3], 1 }
  0xb4   :  { %96 = vsyncpa [#allocation6], 1 }
  0xb5   :  { %97 = vsyncpa [#allocation4], 1 }

</bundles_post_ra>
